<compile_context>
chip_gen: v7x
topology: tpu7x:2x2x1
jax: 0.10.0
libtpu: 0.0.40
codegen_flags: <defaults>
</compile_context>

<pallas_src>
import functools
import numpy as np
import jax
import jax.numpy as jnp
from jax.experimental import pallas as pl
from jax.experimental.pallas import tpu as pltpu


_VMEM_LIMIT_BYTES = 48 * 1024 * 1024   # explicit scoped-VMEM cap (fits v7x 64 MiB)
_ROW_TILE = 256                        # M tile for linear/LN kernels (multiple of 8)
_T_TILE = 256                          # T tile for conv kernels (multiple of 8)


def _cparams(*sem):
    return pltpu.CompilerParams(dimension_semantics=tuple(sem),
                                vmem_limit_bytes=_VMEM_LIMIT_BYTES)


# ----------------------------------------------------------------------------
# Linear kernels (tiled on M, resident bf16 weights, f32 accumulation)
# ----------------------------------------------------------------------------
def _linear_kernel(x_ref, w_ref, b_ref, o_ref):
    acc = jnp.dot(x_ref[...].astype(jnp.bfloat16), w_ref[...],
                  preferred_element_type=jnp.float32)
    o_ref[...] = (acc + b_ref[...]).astype(o_ref.dtype)


def linear(x, w, b, *, out_pad_to=None, tm=_ROW_TILE):
    """x: (M, K) @ w: (K, N) + b: (N,) -> (M, N).

    out_pad_to: if set and N < out_pad_to, the output channel dim is padded to
    that many lanes inside the kernel (lane-dense stores) and sliced back here.
    """
    M, K = x.shape
    N = w.shape[1]
    if out_pad_to is not None and N < out_pad_to:
        w = jnp.pad(w, ((0, 0), (0, out_pad_to - N)))
        b = jnp.pad(b, (0, out_pad_to - N))
        Np = out_pad_to
    else:
        Np = N
    tm_eff = M if M <= tm else tm
    out = pl.pallas_call(
        _linear_kernel,
        out_shape=jax.ShapeDtypeStruct((M, Np), jnp.float32),
        grid=(pl.cdiv(M, tm_eff),),
        in_specs=[pl.BlockSpec((tm_eff, K), lambda i: (i, 0)),
                  pl.BlockSpec((K, Np), lambda i: (0, 0)),
                  pl.BlockSpec((1, Np), lambda i: (0, 0))],
        out_specs=pl.BlockSpec((tm_eff, Np), lambda i: (i, 0)),
        compiler_params=_cparams("parallel"),
    )(x, w.astype(jnp.bfloat16), b.reshape(1, Np))
    return out[:, :N] if Np != N else out


def _linear_add_ln_kernel(x_ref, w_ref, b_ref, r_ref, g_ref, be_ref, o_ref):
    acc = jnp.dot(x_ref[...].astype(jnp.bfloat16), w_ref[...],
                  preferred_element_type=jnp.float32) + b_ref[...]
    y = acc + r_ref[...]
    mean = jnp.mean(y, axis=-1, keepdims=True)
    var = jnp.mean((y - mean) ** 2, axis=-1, keepdims=True)
    y = (y - mean) * jax.lax.rsqrt(var + 1e-5)
    o_ref[...] = (y * g_ref[...] + be_ref[...]).astype(o_ref.dtype)


def linear_add_ln(x, w, b, res, gamma, beta, *, tm=_ROW_TILE):
    """LayerNorm(x @ w + b + res); fused projection + residual + LN (eps=1e-5)."""
    M, K = x.shape
    N = w.shape[1]
    tm_eff = M if M <= tm else tm
    return pl.pallas_call(
        _linear_add_ln_kernel,
        out_shape=jax.ShapeDtypeStruct((M, N), jnp.float32),
        grid=(pl.cdiv(M, tm_eff),),
        in_specs=[pl.BlockSpec((tm_eff, K), lambda i: (i, 0)),
                  pl.BlockSpec((K, N), lambda i: (0, 0)),
                  pl.BlockSpec((1, N), lambda i: (0, 0)),
                  pl.BlockSpec((tm_eff, N), lambda i: (i, 0)),
                  pl.BlockSpec((1, N), lambda i: (0, 0)),
                  pl.BlockSpec((1, N), lambda i: (0, 0))],
        out_specs=pl.BlockSpec((tm_eff, N), lambda i: (i, 0)),
        compiler_params=_cparams("parallel"),
    )(x, w.astype(jnp.bfloat16), b.reshape(1, N), res,
      gamma.reshape(1, N), beta.reshape(1, N))


# ----------------------------------------------------------------------------
# Conv1d ('same') with fused epilogues, im2col matmul, (B, T-tiles) grid
# ----------------------------------------------------------------------------
def _make_conv_kernel(*, K, tT, tiled_T, relu, has_res, has_ln, has_proj):
    def kernel(*refs):
        it = iter(refs)
        xp_ref = next(it)          # (1, Tp, Cin)  (padded, resident per batch)
        w_ref = next(it)           # (K*Cin, Cout) bf16
        b_ref = next(it)           # (1, Cout)
        r_ref = next(it) if has_res else None
        g_ref = next(it) if has_ln else None
        be_ref = next(it) if has_ln else None
        wp_ref = next(it) if has_proj else None
        bp_ref = next(it) if has_proj else None
        o_ref = next(it)

        if tiled_T:
            start = pl.multiple_of(pl.program_id(1) * tT, 8)
        else:
            start = 0  # single T tile -> static window (demo sizes hit this path)

        # im2col: one deep-contraction matmul instead of K shallow tap matmuls.
        cols = [xp_ref[0, pl.ds(start + t, tT), :] for t in range(K)]
        xwin = cols[0] if K == 1 else jnp.concatenate(cols, axis=-1)  # (tT, K*Cin)
        acc = jnp.dot(xwin.astype(jnp.bfloat16), w_ref[...],
                      preferred_element_type=jnp.float32)
        acc = acc + b_ref[...]
        if relu:
            acc = jnp.maximum(acc, 0.0)
        if has_res:
            acc = acc + r_ref[0]
        if has_ln:
            mean = jnp.mean(acc, axis=-1, keepdims=True)
            var = jnp.mean((acc - mean) ** 2, axis=-1, keepdims=True)
            acc = (acc - mean) * jax.lax.rsqrt(var + 1e-5)
            acc = acc * g_ref[...] + be_ref[...]
        if has_proj:
            acc = jnp.dot(acc.astype(jnp.bfloat16), wp_ref[...],
                          preferred_element_type=jnp.float32) + bp_ref[...]
        o_ref[0] = acc.astype(o_ref.dtype)
    return kernel


def conv1d_fused(x, w, b, *, relu=False, res=None, ln=None, proj=None, tT=_T_TILE):
    """'same' 1-D conv with optional fused epilogue.

    x: (B, T, Cin), w: (K, Cin, Cout), b: (Cout,).
    relu -> max(·,0); res (B,T,Cout) -> residual add; ln {'g','b'} -> LayerNorm;
    proj {'w':(Cout,Nout),'b':(Nout,)} -> trailing projection.
    Epilogue order: conv, relu, +res, LN, proj (matches the reference modules).
    """
    B, T, Cin = x.shape
    K, _, Cout = w.shape
    pad_l = (K - 1) // 2
    pad_r = K - 1 - pad_l

    tT_eff = T if T <= tT else tT
    nT = -(-T // tT_eff)
    T_pad = nT * tT_eff
    xp = jnp.pad(x, ((0, 0), (pad_l, (T_pad - T) + pad_r), (0, 0)))
    Tp = T_pad + K - 1
    w_flat = w.reshape(K * Cin, Cout).astype(jnp.bfloat16)

    has_res, has_ln, has_proj = res is not None, ln is not None, proj is not None
    Nout = proj['w'].shape[1] if has_proj else Cout

    kern = _make_conv_kernel(K=K, tT=tT_eff, tiled_T=(nT > 1), relu=relu,
                             has_res=has_res, has_ln=has_ln, has_proj=has_proj)

    in_specs = [pl.BlockSpec((1, Tp, Cin), lambda bi, ti: (bi, 0, 0)),
                pl.BlockSpec((K * Cin, Cout), lambda bi, ti: (0, 0)),
                pl.BlockSpec((1, Cout), lambda bi, ti: (0, 0))]
    args = [xp, w_flat, b.reshape(1, Cout)]
    if has_res:
        in_specs.append(pl.BlockSpec((1, tT_eff, Cout), lambda bi, ti: (bi, ti, 0)))
        args.append(res)
    if has_ln:
        in_specs += [pl.BlockSpec((1, Cout), lambda bi, ti: (0, 0)),
                     pl.BlockSpec((1, Cout), lambda bi, ti: (0, 0))]
        args += [ln['g'].reshape(1, Cout), ln['b'].reshape(1, Cout)]
    if has_proj:
        in_specs += [pl.BlockSpec((Cout, Nout), lambda bi, ti: (0, 0)),
                     pl.BlockSpec((1, Nout), lambda bi, ti: (0, 0))]
        args += [proj['w'].astype(jnp.bfloat16), proj['b'].reshape(1, Nout)]

    return pl.pallas_call(
        kern,
        out_shape=jax.ShapeDtypeStruct((B, T, Nout), jnp.float32),
        grid=(B, nT),
        in_specs=in_specs,
        out_specs=pl.BlockSpec((1, tT_eff, Nout), lambda bi, ti: (bi, ti, 0)),
        compiler_params=_cparams("parallel", "parallel"),
    )(*args)


# ----------------------------------------------------------------------------
# Attention: all heads of one batch element per grid step, key-pad bias in-kernel
# ----------------------------------------------------------------------------
def _attn_kernel(qkv_ref, kpad_ref, o_ref, *, H, dk, dv, scale):
    # qkv_ref: (1, T, H*(2*dk+dv)); kpad_ref: (1, 1, T) float (1 = padded key)
    bias = jnp.where(kpad_ref[0] > 0.5, -1e9, 0.0)          # (1, T)
    qoff, koff, voff = 0, H * dk, 2 * H * dk
    outs = []
    for h in range(H):                                       # static unroll over heads
        q = qkv_ref[0, :, pl.ds(qoff + h * dk, dk)].astype(jnp.bfloat16)
        k = qkv_ref[0, :, pl.ds(koff + h * dk, dk)].astype(jnp.bfloat16)
        v = qkv_ref[0, :, pl.ds(voff + h * dv, dv)].astype(jnp.bfloat16)
        s = jax.lax.dot_general(q, k, (((1,), (1,)), ((), ())),
                                preferred_element_type=jnp.float32) * scale
        s = s + bias                                         # broadcast over queries
        s = s - jnp.max(s, axis=-1, keepdims=True)
        e = jnp.exp(s)
        p = e * pl.reciprocal(jnp.sum(e, axis=-1, keepdims=True), approx=True)
        outs.append(jnp.dot(p.astype(jnp.bfloat16), v,
                            preferred_element_type=jnp.float32))
    o_ref[0] = jnp.concatenate(outs, axis=-1).astype(o_ref.dtype)
    # TODO(synk): flash-style key tiling for very long mel sequences (bounds the
    # (T, T) score tile inside v7x's 64 MiB VMEM); not needed at these sizes.


def sdp_attention(qkv, kpad, n_head, d_k, d_v):
    """qkv: (B, T, H*(2*dk+dv)) fused projections, kpad: (B, T) float (1 = pad)."""
    B, T, Htot = qkv.shape
    kern = functools.partial(_attn_kernel, H=n_head, dk=d_k, dv=d_v,
                             scale=1.0 / float(np.sqrt(d_k)))
    return pl.pallas_call(
        kern,
        out_shape=jax.ShapeDtypeStruct((B, T, n_head * d_v), jnp.float32),
        grid=(B,),
        in_specs=[pl.BlockSpec((1, T, Htot), lambda b: (b, 0, 0)),
                  pl.BlockSpec((1, 1, T), lambda b: (b, 0, 0))],
        out_specs=pl.BlockSpec((1, T, n_head * d_v), lambda b: (b, 0, 0)),
        compiler_params=_cparams("parallel"),
    )(qkv, kpad.reshape(B, 1, T))


# ----------------------------------------------------------------------------
# Model building blocks
# ----------------------------------------------------------------------------
def multi_head_attention(x, p, kpad_mask, n_head, d_k, d_v):
    B, T, D = x.shape
    xf = x.reshape(B * T, D)
    qkv = linear(xf, p['qkv']['w'], p['qkv']['b'])               # fused Q/K/V
    attn = sdp_attention(qkv.reshape(B, T, -1), kpad_mask, n_head, d_k, d_v)
    out = linear_add_ln(attn.reshape(B * T, n_head * d_v),        # fc + res + LN
                        p['fc']['w'], p['fc']['b'],
                        xf, p['ln']['g'], p['ln']['b'])
    return out.reshape(B, T, D)


def pos_ffn(x, p):
    h = conv1d_fused(x, p['w1']['w'], p['w1']['b'], relu=True)
    out = conv1d_fused(h, p['w2']['w'], p['w2']['b'], relu=False,
                       res=x, ln=p['ln'])                         # conv2 + res + LN
    return out


def fft_block(x, p, non_pad_mask, kpad_mask, cfg):
    out = multi_head_attention(x, p['attn'], kpad_mask,
                               cfg['n_head'], cfg['d_k'], cfg['d_v'])
    out = out * non_pad_mask
    out = pos_ffn(out, p['ffn'])
    out = out * non_pad_mask
    return out


def variance_predictor(x, p):
    h = conv1d_fused(x, p['c1']['w'], p['c1']['b'], relu=True, ln=p['ln1'])
    out = conv1d_fused(h, p['c2']['w'], p['c2']['b'], relu=True, ln=p['ln2'],
                       proj=p['out'])                             # conv+relu+LN+proj
    return out[..., 0]                                            # (B, T)


def length_regulator(x, durations, mel_max_length):
    """Repeat phoneme i durations[b, i] times along time; pad to mel_max_length."""
    B, T, D = x.shape
    cum = jnp.cumsum(durations, axis=-1)                          # (B, T)
    total = cum[:, -1]
    t_idx = jnp.arange(mel_max_length)
    idx = jax.vmap(lambda c: jnp.searchsorted(c, t_idx, side='right'))(cum)
    valid = t_idx[None, :] < total[:, None]
    idx = jnp.minimum(idx, T - 1)
    out = jnp.take_along_axis(x, idx[..., None], axis=1)
    return out * valid[..., None].astype(x.dtype)


def variance_adaptor(x, p, length_target, pitch_target, energy_target,
                     mel_max_length, mask):
    log_dur_pred = variance_predictor(x, p['duration'])           # (B, Tsrc)
    out = length_regulator(x, length_target, mel_max_length)      # (B, Tmel, D)

    pitch_pred = variance_predictor(out, p['pitch'])
    pitch_pred = jnp.where(mask, 0.0, pitch_pred)
    pitch_emb = p['pitch_emb'][jnp.digitize(pitch_target, p['pitch_bins'])]

    energy_pred = variance_predictor(out, p['energy'])
    energy_pred = jnp.where(mask, 0.0, energy_pred)
    energy_emb = p['energy_emb'][jnp.digitize(energy_target, p['energy_bins'])]

    out = out + pitch_emb + energy_emb
    return out, log_dur_pred, pitch_pred, energy_pred


def mask_tensor(mel_output, position, mel_max_length):
    lengths = jnp.max(position, axis=-1)
    ids = jnp.arange(mel_max_length)
    pad = ids[None, :] >= lengths[:, None]
    return jnp.where(pad[..., None], 0.0, mel_output)


def fastspeech_second_forward(params, cfg, src_seq, src_pos, mel_pos,
                              mel_max_length, length_target,
                              pitch_target, energy_target,
                              alpha=1.0, alpha_p=1.0, alpha_e=1.0):
    B, Ts = src_seq.shape
    D = cfg['encoder_dim']

    # ---------------- Encoder ----------------
    non_pad_mask = (src_seq != 0).astype(jnp.float32)[..., None]   # (B, Ts, 1)
    enc_kpad = (src_seq == 0).astype(jnp.float32)                  # (B, Ts) key-pad
    x = params['src_emb'][src_seq] + params['pos_enc'][src_pos]
    for lp in params['encoder_layers']:
        x = fft_block(x, lp, non_pad_mask, enc_kpad, cfg)

    # ---------------- Variance adaptor (training branch) ----------------
    mask = (mel_pos == 0)
    out, dur_pred, pitch_pred, energy_pred = variance_adaptor(
        x, params, length_target, pitch_target, energy_target,
        mel_max_length, mask)

    # ---------------- Decoder ----------------
    Tm = mel_pos.shape[1]
    dec_non_pad = (mel_pos != 0).astype(jnp.float32)[..., None]
    dec_kpad = (mel_pos == 0).astype(jnp.float32)
    d = out + params['pos_enc'][mel_pos]
    for lp in params['decoder_layers']:
        d = fft_block(d, lp, dec_non_pad, dec_kpad, cfg)

    d = mask_tensor(d, mel_pos, mel_max_length)
    mel = linear(d.reshape(B * Tm, D),
                 params['mel_linear']['w'], params['mel_linear']['b'],
                 out_pad_to=128)                                   # lane-dense store
    mel = mel.reshape(B, Tm, cfg['num_mels'])
    return mel, dur_pred, pitch_pred, energy_pred


# ----------------------------------------------------------------------------
# Deterministic parameter construction
# ----------------------------------------------------------------------------
class PRNG:
    def __init__(self, seed=0):
        self.key = jax.random.PRNGKey(seed)

    def next(self):
        self.key, sub = jax.random.split(self.key)
        return sub


def init_linear(rng, din, dout, scale=0.1):
    return {'w': jax.random.normal(rng.next(), (din, dout), jnp.float32) * scale,
            'b': jnp.zeros((dout,), jnp.float32)}


def init_conv(rng, cin, cout, k, scale=0.1):
    return {'w': jax.random.normal(rng.next(), (k, cin, cout), jnp.float32) * scale,
            'b': jnp.zeros((cout,), jnp.float32)}


def init_ln(d):
    return {'g': jnp.ones((d,), jnp.float32), 'b': jnp.zeros((d,), jnp.float32)}


def sinusoid_table(n_position, d_hid, padding_idx=0):
    position = np.arange(n_position)[:, None].astype(np.float64)
    div = np.power(10000.0, 2 * (np.arange(d_hid) // 2) / d_hid)
    table = position / div
    table[:, 0::2] = np.sin(table[:, 0::2])
    table[:, 1::2] = np.cos(table[:, 1::2])
    table[padding_idx] = 0.0
    return jnp.asarray(table, jnp.float32)


def init_params(cfg, rng):
    D = cfg['encoder_dim']

    def fft_layer():
        wq = init_linear(rng, D, cfg['n_head'] * cfg['d_k'])
        wk = init_linear(rng, D, cfg['n_head'] * cfg['d_k'])
        wv = init_linear(rng, D, cfg['n_head'] * cfg['d_v'])
        return {
            'attn': {
                'qkv': {'w': jnp.concatenate([wq['w'], wk['w'], wv['w']], axis=1),
                        'b': jnp.concatenate([wq['b'], wk['b'], wv['b']])},
                'fc': init_linear(rng, cfg['n_head'] * cfg['d_v'], D),
                'ln': init_ln(D),
            },
            'ffn': {
                'w1': init_conv(rng, D, cfg['fft_filter'], cfg['fft_kernel'][0]),
                'w2': init_conv(rng, cfg['fft_filter'], D, cfg['fft_kernel'][1]),
                'ln': init_ln(D),
            },
        }

    def var_predictor():
        F = cfg['var_filter']
        return {
            'c1': init_conv(rng, D, F, cfg['var_kernel']),
            'ln1': init_ln(F),
            'c2': init_conv(rng, F, F, cfg['var_kernel']),
            'ln2': init_ln(F),
            'out': init_linear(rng, F, 1),
        }

    src_emb = jax.random.normal(rng.next(), (cfg['vocab'], D), jnp.float32) * 0.1
    src_emb = src_emb.at[0].set(0.0)  # padding_idx=0

    return {
        'src_emb': src_emb,
        'pos_enc': sinusoid_table(cfg['n_position'], D),
        'encoder_layers': [fft_layer() for _ in range(cfg['n_layers'])],
        'duration': var_predictor(),
        'pitch': var_predictor(),
        'energy': var_predictor(),
        'pitch_bins': jnp.linspace(0.0, 1.0, cfg['n_bins'] - 1),
        'energy_bins': jnp.linspace(0.0, 1.0, cfg['n_bins'] - 1),
        'pitch_emb': jax.random.normal(rng.next(), (cfg['n_bins'], D), jnp.float32) * 0.1,
        'energy_emb': jax.random.normal(rng.next(), (cfg['n_bins'], D), jnp.float32) * 0.1,
        'decoder_layers': [fft_layer() for _ in range(cfg['n_layers'])],
        'mel_linear': init_linear(rng, cfg['decoder_dim'], cfg['num_mels']),
    }


# ----------------------------------------------------------------------------
if __name__ == "__main__":
    cfg = dict(
        vocab=40, n_position=64,
        encoder_dim=32, decoder_dim=32, n_layers=2,
        n_head=2, d_k=16, d_v=16,
        fft_filter=64, fft_kernel=(9, 1),
        var_filter=64, var_kernel=3,
        n_bins=32, num_mels=24,
    )

    rng = PRNG(0)
    params = init_params(cfg, rng)

    B, Ts = 2, 8
    mel_max_length = 20

    key = jax.random.PRNGKey(0)
    k1, k2, k3, k4 = jax.random.split(key, 4)

    src_seq = jax.random.randint(k1, (B, Ts), 1, cfg['vocab'])
    src_seq = src_seq.at[1, 6:].set(0)                        # pad tail of batch 1
    src_pos = jnp.where(src_seq != 0, jnp.arange(1, Ts + 1)[None, :], 0)

    length_target = jax.random.randint(k2, (B, Ts), 1, 3)     # durations in {1, 2}
    length_target = jnp.where(src_seq != 0, length_target, 0)
    totals = np.asarray(jnp.sum(length_target, axis=-1))      # <= 16 < mel_max_length

    mel_pos_np = np.zeros((B, mel_max_length), np.int32)
    for b in range(B):
        mel_pos_np[b, :totals[b]] = np.arange(1, totals[b] + 1)
    mel_pos = jnp.asarray(mel_pos_np)

    pitch_target = jax.random.uniform(k3, (B, mel_max_length)) * (mel_pos != 0)
    energy_target = jax.random.uniform(k4, (B, mel_max_length)) * (mel_pos != 0)

    outs = fastspeech_second_forward(
        params, cfg, src_seq, src_pos, mel_pos, mel_max_length,
        length_target, pitch_target, energy_target,
        alpha=1.0, alpha_p=1.0, alpha_e=1.0)

    outs = jax.block_until_ready(outs)
    mel, dur_pred, pitch_pred, energy_pred = outs
    assert mel.shape == (B, mel_max_length, cfg['num_mels'])
    assert dur_pred.shape == (B, Ts)
    assert pitch_pred.shape == (B, mel_max_length)
    assert energy_pred.shape == (B, mel_max_length)
    assert all(bool(jnp.all(jnp.isfinite(o))) for o in outs)
    print("KERNEL_OK")
</pallas_src>

<mosaic_0001>
module attributes {stable_mosaic.version = 11 : i64} {
  func.func @_linear_kernel(%arg0: i32, %arg1: memref<16x32xf32, #tpu.memory_space<vmem>>, %arg2: memref<32x96xbf16, #tpu.memory_space<vmem>>, %arg3: memref<1x96xf32, #tpu.memory_space<vmem>>, %arg4: memref<16x96xf32, #tpu.memory_space<vmem>>) attributes {dimension_semantics = [#tpu.dimension_semantics<parallel>], iteration_bounds = array<i64: 1>, scalar_prefetch = 0 : i64, scratch_operands = 0 : i64, tpu.core_type = #tpu.core_type<tc>, window_params = [{transform_indices = @transform_0, window_bounds = array<i64: 16, 32>}, {pipeline_mode = #tpu.pipeline_mode<synchronous>, transform_indices = @transform_1, window_bounds = array<i64: 32, 96>}, {pipeline_mode = #tpu.pipeline_mode<synchronous>, transform_indices = @transform_2, window_bounds = array<i64: 1, 96>}, {transform_indices = @transform_3, window_bounds = array<i64: 16, 96>}]} {
    %c0 = arith.constant 0 : index
    %c0_0 = arith.constant 0 : index
    %0 = vector.load %arg1[%c0, %c0_0] : memref<16x32xf32, #tpu.memory_space<vmem>>, vector<16x32xf32>
    %1 = arith.truncf %0 : vector<16x32xf32> to vector<16x32xbf16>
    %c0_1 = arith.constant 0 : index
    %c0_2 = arith.constant 0 : index
    %2 = vector.load %arg2[%c0_1, %c0_2] : memref<32x96xbf16, #tpu.memory_space<vmem>>, vector<32x96xbf16>
    %cst = arith.constant dense<0.000000e+00> : vector<16x96xf32>
    %3 = tpu.matmul %1, %2, %cst {dimension_numbers = #tpu.dot_dimension_numbers<[1], [0], [0], [1], [0, 0, 1, 1], [], []>} : vector<16x32xbf16>, vector<32x96xbf16>, vector<16x96xf32> -> vector<16x96xf32>
    %c0_3 = arith.constant 0 : index
    %c0_4 = arith.constant 0 : index
    %4 = vector.load %arg3[%c0_3, %c0_4] : memref<1x96xf32, #tpu.memory_space<vmem>>, vector<1x96xf32>
    %5 = vector.broadcast %4 : vector<1x96xf32> to vector<16x96xf32>
    %6 = arith.addf %3, %5 : vector<16x96xf32>
    %c0_5 = arith.constant 0 : index
    %c0_6 = arith.constant 0 : index
    %7 = vector.load %arg4[%c0_5, %c0_6] : memref<16x96xf32, #tpu.memory_space<vmem>>, vector<16x96xf32>
    tpu.vector_store %arg4[%c0_5, %c0_6], %6 {strides = array<i32>} : memref<16x96xf32, #tpu.memory_space<vmem>>, vector<16x96xf32>,
    return
  }
  func.func @transform_0(%arg0: i32) -> (i32, i32) {
    %c0_i32 = arith.constant 0 : i32
    %c0_i32_0 = arith.constant 0 : i32
    return %arg0, %c0_i32 : i32, i32
  }
  func.func @transform_1(%arg0: i32) -> (i32, i32) {
    %c0_i32 = arith.constant 0 : i32
    %c0_i32_0 = arith.constant 0 : i32
    %c0_i32_1 = arith.constant 0 : i32
    return %c0_i32, %c0_i32_0 : i32, i32
  }
  func.func @transform_2(%arg0: i32) -> (i32, i32) {
    %c0_i32 = arith.constant 0 : i32
    %c0_i32_0 = arith.constant 0 : i32
    %c0_i32_1 = arith.constant 0 : i32
    return %c0_i32, %c0_i32_0 : i32, i32
  }
  func.func @transform_3(%arg0: i32) -> (i32, i32) {
    %c0_i32 = arith.constant 0 : i32
    %c0_i32_0 = arith.constant 0 : i32
    return %arg0, %c0_i32 : i32, i32
  }
}

</mosaic_0001>

<bundles_post_ra>
// kernel: tpu_custom_call.1
= control target key start
LH: loop header
LB: loop body
LE: loop exit
PB: predicated region body
PF: predicated region fallthrough
CT: control target
= control target key end

     0   :  { %8 = vsyncpa [#allocation3], 0  ;;  %s308_s0 = inlined_call_operand.hbm [shape: f32[16,32], index: 0, kind: input, shape index: {}]   ;;  %s309_s1 = inlined_call_operand.hbm [shape: bf16[32,96], index: 1, kind: input, shape index: {}]   ;;  %s310_s2 = inlined_call_operand.vmem [shape: f32[1,96], index: 2, kind: input, shape index: {}]   ;;  %s311_s3 = inlined_call_operand.hbm [shape: f32[16,96], index: 3, kind: output, shape index: {}]  }
   0x1   :  { %9 = vsyncpa [#allocation6], 0 }
   0x2   :  { %10 = vsyncpa [#allocation4], 0  ;;  %s234_s12 = smov [#allocation2]   ;;  %s162_s16 = scalar_lea.hbm %s308_s0, 256 }
   0x3   :  { %s16_s13 = sshll.u32 %s234_s12, 4  ;;  %p163_p0 = scmp.ne.s32.totalorder %s308_s0, %s162_s16  ;;  %s17_s13 = int_to_ptr.vmem [resolvable:$true] %s16_s13 }
   0x4   :  { %p166_p1 = scmp.lt.u32.totalorder %s162_s16, %s308_s0 }
   0x6   :  { %p168_p2 = pnand %p166_p1, %p163_p0 }
   0x8   :  { %171 = shalt.err (!%p168_p2)
}
   0x9   :  { %s172_s21 = scalar_lea.vmem %s17_s13, 256  ;;  %p177_p4 = scmp.lt.s32.totalorder %s17_s13, %s17_s13 }
   0xa   :  { %p173_p3 = scmp.ne.s32.totalorder %s17_s13, %s172_s21  ;;  %p178_p5 = scmp.lt.s32.totalorder %s172_s21, %s172_s21 }
   0xc   :  { %p179_p6 = por %p178_p5, %p177_p4 }
   0xe   :  { %p180_p7 = pnand %p179_p6, %p173_p3 }
  0x10   :  { %183 = shalt.err (!%p180_p7)
}
  0x11   :  { %s235_s22 = smov 128   ;;  %s236_s23 = smov 8  }
  0x12   :  { %22 = dma.hbm_to_vmem [thread:$0]  %s308_s0, 256, %s17_s13, [#allocation3], %s235_s22, %s235_s22, %s236_s23  }
  0x13   :  { %s237_s26 = smov [#allocation5]   ;;  %s184_s30 = scalar_lea.hbm %s309_s1, 256 }
  0x14   :  { %s28_s27 = sshll.u32 %s237_s26, 4  ;;  %p185_p8 = scmp.ne.s32.totalorder %s309_s1, %s184_s30  ;;  %s29_s27 = int_to_ptr.vmem [resolvable:$true] %s28_s27 }
  0x15   :  { %p188_p9 = scmp.lt.u32.totalorder %s184_s30, %s309_s1 }
  0x17   :  { %p190_p10 = pnand %p188_p9, %p185_p8 }
  0x19   :  { %193 = shalt.err (!%p190_p10)
}
  0x1a   :  { %s194_s8 = scalar_lea.vmem %s29_s27, 256  ;;  %p199_p12 = scmp.lt.s32.totalorder %s29_s27, %s29_s27 }
  0x1b   :  { %p195_p11 = scmp.ne.s32.totalorder %s29_s27, %s194_s8  ;;  %p200_p13 = scmp.lt.s32.totalorder %s194_s8, %s194_s8 }
  0x1d   :  { %p201_p0 = por %p200_p13, %p199_p12 }
  0x1f   :  { %p202_p1 = pnand %p201_p0, %p195_p11 }
  0x21   :  { %205 = shalt.err (!%p202_p1)
}
  0x22   :  { %s238_s0 = smov 64   ;;  %s239_s9 = smov 4  }
  0x23   :  { %34 = dma.hbm_to_vmem [thread:$0]  %s309_s1, 256, %s29_s27, [#allocation6], %s238_s0, %s238_s0, %s239_s9  }
  0x24   :  { %228 = dma.done.wait [#allocation3], 256  }
  0x25   :  { %229 = vsyncadd [#allocation3], 4294967040 }
  0x26   :  { %230 = dma.done.wait [#allocation6], 256  }
  0x27   :  { %231 = vsyncadd [#allocation6], 4294967040  ;;  %v240_v0 = vmov 0.0   ;;  %vm241_vm0 = vmmov 0   ;;  %v160_v1 = vld [vmem:[#allocation5] sm:$0xff]   ;;  %v161_v2 = vld [vmem:[#allocation5 + $0x8] sm:$0xff]  }
  0x28   :  { %143 = vmatprep.subr.bf16.mxu0 %v240_v0  ;;  %147 = vmatprep.mubr.msk.bf16.mxu0 %vm241_vm0, %v240_v0  ;;  %v44_v3 = vld [vmem:[#allocation2] sm:$0xff]  ;;  %v45_v4 = vld [vmem:[#allocation2 + $0x8] sm:$0xff]  ;;  %vm70_vm1 = vcmask 261120   ;;  %vm115_vm2 = vcmask 785408   ;;  %s242_s13 = smov [#allocation7]  }
  0x29   :  { %144 = vmatpush3.bf16.msra.mxu0 %v160_v1  ;;  %v46_v5 = vpack.c.bf16 %v45_v4, %v44_v3  ;;  %v136_v6 = vld [vmem:[%s310_s2] ss:$0 sm:$0xff]  ;;  %s123_s14 = sshll.u32 %s242_s13, 4  ;;  %s124_s14 = int_to_ptr.vmem [resolvable:$true] %s123_s14 }
  0x2a   :  { %145 = vmatprep.subr.bf16.mxu0 %v240_v0  ;;  %s206_s15 = scalar_lea.vmem %s124_s14, 256  ;;  %p211_p3 = scmp.lt.s32.totalorder %s124_s14, %s124_s14 }
  0x2b   :  { %p207_p2 = scmp.ne.s32.totalorder %s124_s14, %s206_s15  ;;  %p212_p4 = scmp.lt.s32.totalorder %s206_s15, %s206_s15 }
  0x2d   :  { %146 = vmatpush3.bf16.msra.mxu0 %v161_v2  ;;  %p213_p5 = por %p212_p4, %p211_p3 }
  0x2f   :  { %p214_p6 = pnand %p213_p5, %p207_p2 }
  0x30   :  { %148 = vmatmul.mubr.msk.bf16.vlgmr.msra.gmra.mrb[0].mxu0 %vm70_vm1, %v46_v5 }
 0x103   :  { %v108_v7 = vpop.f32.mrb[0].mxu0 }
 0x104   :  { %v109_v8 = vadd.f32 %v136_v6, %v108_v7  ;;  %v149_v9 = vpop.f32.mrb[1].mxu0 }
 0x105   :  { %v111_v10 = vpop.f32.mrb[2].mxu0 }
 0x106   :  { %v112_v11 = vadd.f32 %v136_v6, %v111_v10  ;;  %v150_v12 = vpop.f32.mrb[3].mxu0  ;;  %116 = vst.msk [vmem:[#allocation7] sm:$0xff] %vm115_vm2, %v109_v8 }
 0x108   :  { %117 = vst.msk [vmem:[#allocation7 + $0x8] sm:$0xff] %vm115_vm2, %v112_v11 }
 0x109   :  { %217 = shalt.err (!%p214_p6)
}
 0x10a   :  { %s218_s17 = scalar_lea.hbm %s311_s3, 256 }
 0x10b   :  { %p219_p7 = scmp.ne.s32.totalorder %s311_s3, %s218_s17  ;;  %p222_p8 = scmp.lt.u32.totalorder %s218_s17, %s311_s3 }
 0x10d   :  { %p224_p9 = pnand %p222_p8, %p219_p7 }
 0x10f   :  { %227 = shalt.err (!%p224_p9)
}
 0x110   :  { %129 = dma.vmem_to_hbm [thread:$0]  %s124_s14, 256, %s311_s3, [#allocation4], %s235_s22, %s235_s22, %s236_s23  }
 0x111   :  { %232 = dma.done.wait [#allocation4], 256  }
 0x112   :  { %233 = vsyncadd [#allocation4], 4294967040 }
 0x113   :  { %133 = vsyncpa [#allocation3], 1 }
 0x114   :  { %134 = vsyncpa [#allocation6], 1 }
 0x115   :  { %135 = vsyncpa [#allocation4], 1 }

</bundles_post_ra>
